<compile_context>
chip_gen: v7x
topology: tpu7x:2x2x1
jax: 0.10.0
libtpu: 0.0.40
codegen_flags: <defaults>
</compile_context>

<pallas_src>
import functools

import jax
import jax.numpy as jnp
from jax.experimental import pallas as pl
from jax.experimental.pallas import tpu as pltpu

_EPS = 1e-6  # torch.nn.functional.pairwise_distance default eps (added to diff)


def _quadruplet_loss_kernel(a_ref, p_ref, n1_ref, n2_ref, loss_ref,
                            *, margin1: float, margin2: float):
    a = a_ref[...]
    p = p_ref[...]
    n1 = n1_ref[...]
    n2 = n2_ref[...]

    # pairwise_distance(x1, x2) = || x1 - x2 + eps ||_2 per row.
    # Subtraction stays in the input dtype (bf16-native VPU on v6e/v7x, and a
    # no-op change for f32); squaring / accumulation / sqrt are f32.
    def pdist(x, y):
        d = (x - y).astype(jnp.float32) + _EPS
        return jnp.sqrt(jnp.sum(d * d, axis=-1, keepdims=True))  # (TB, 1) f32

    d_pos = pdist(a, p)
    d_neg = pdist(a, n1)
    d_neg_b = pdist(n1, n2)

    loss_ref[...] = (jnp.maximum(d_pos - d_neg + margin1, 0.0)
                     + jnp.maximum(d_pos - d_neg_b + margin2, 0.0))


def _vmem_budgets() -> tuple[int, int]:
    """Returns (tile_budget_bytes, vmem_limit_bytes) for this TPU generation."""
    try:
        cap = int(pltpu.get_tpu_info().vmem_capacity_bytes)
    except Exception:
        cap = 64 * 1024 * 1024  # conservative fallback: v7x physical VMEM
    # Scoped limit: ~3/4 of physical VMEM (96 MiB on v5e/v6e, 48 MiB on v7x).
    vmem_limit = min((cap * 3) // 4, 112 * 1024 * 1024)
    # Solve the tile size against ~2/3 of that limit, leaving headroom for
    # Mosaic internal scratch and anything unaccounted.
    tile_budget = (vmem_limit * 2) // 3
    return tile_budget, vmem_limit


def _pick_tile_rows(B: int, D: int, itemsize: int, budget_bytes: int) -> int:
    # Sublane alignment for the input dtype (f32: 8, bf16: 16, 8-bit: 32).
    align = 8 * max(1, 4 // itemsize)
    if B <= align:
        return B  # single full-extent block (always legal)
    # Per-row VMEM: 4 inputs x 2 pipeline buffers in the native dtype, plus
    # ~4 live f32 (TB, D) temporaries inside the kernel (per-pdist diffs and
    # squares spilled past the 64-vreg file), plus the tiny output buffers.
    per_row = 4 * 2 * D * itemsize + 4 * D * 4 + 2 * 4
    tb = max(align, budget_bytes // max(per_row, 1))
    tb -= tb % align
    # Keep at least two grid steps whenever B allows it: shards the batch axis
    # across both TensorCores on v7x and keeps the DMA/compute pipeline busy
    # on single-TC parts.  (Step overhead is ~0.35 us -> negligible.)
    half = -(-B // 2)                    # ceil(B / 2)
    half = -(-half // align) * align     # rounded up to sublane alignment
    tb = min(tb, half)
    return max(tb, align)


def quadruplet_loss(anchor, positive, negative1, negative2,
                    margin1: float = 1.0, margin2: float = 0.5,
                    tile_rows: int | None = None):
    B, D = anchor.shape
    itemsize = jnp.dtype(anchor.dtype).itemsize
    tile_budget, vmem_limit = _vmem_budgets()
    TB = tile_rows if tile_rows is not None else _pick_tile_rows(
        B, D, itemsize, tile_budget)
    num_tiles = pl.cdiv(B, TB)

    kernel = functools.partial(
        _quadruplet_loss_kernel, margin1=float(margin1), margin2=float(margin2))

    # Advisory cost: 3 pairwise distances (sub, +eps, mul, accumulate) per
    # element, one sqrt per distance per row, pure streaming traffic.
    cost = pl.CostEstimate(
        flops=12 * B * D,
        transcendentals=3 * B,
        bytes_accessed=4 * B * D * itemsize + 4 * B)

    in_spec = pl.BlockSpec((TB, D), lambda i: (i, 0))
    per_row_loss = pl.pallas_call(
        kernel,
        grid=(num_tiles,),
        in_specs=[in_spec, in_spec, in_spec, in_spec],
        out_specs=pl.BlockSpec((TB, 1), lambda i: (i, 0)),
        out_shape=jax.ShapeDtypeStruct((B, 1), jnp.float32),
        compiler_params=pltpu.CompilerParams(
            dimension_semantics=("parallel",),
            vmem_limit_bytes=int(vmem_limit)),
        cost_estimate=cost,
    )(anchor, positive, negative1, negative2)

    # Final mean in the wrapper (divides by the true B; padded rows of a
    # partial last tile never reach HBM because Pallas clips OOB writes).
    return jnp.mean(per_row_loss)


def quadruplet_loss_ref(anchor, positive, negative1, negative2,
                        margin1=1.0, margin2=0.5):
    # Pure-JAX reference (mirrors the PyTorch module) for sanity checking.
    def pdist(x, y):
        d = x.astype(jnp.float32) - y.astype(jnp.float32) + _EPS
        return jnp.sqrt(jnp.sum(d * d, axis=-1))

    d_pos = pdist(anchor, positive)
    d_neg = pdist(anchor, negative1)
    d_neg_b = pdist(negative1, negative2)
    loss = (jnp.maximum(d_pos - d_neg + margin1, 0.0)
            + jnp.maximum(d_pos - d_neg_b + margin2, 0.0))
    return jnp.mean(loss)


if __name__ == "__main__":
    key = jax.random.PRNGKey(0)
    k_a, k_p, k_n1, k_n2 = jax.random.split(key, 4)

    B, D = 24, 256
    anchor = jax.random.normal(k_a, (B, D), dtype=jnp.float32)
    positive = jax.random.normal(k_p, (B, D), dtype=jnp.float32)
    negative1 = jax.random.normal(k_n1, (B, D), dtype=jnp.float32)
    negative2 = jax.random.normal(k_n2, (B, D), dtype=jnp.float32)

    # Case 1: explicit small tile -> 3-step parallel grid.
    out = quadruplet_loss(anchor, positive, negative1, negative2, tile_rows=8)
    jax.block_until_ready(out)
    ref = quadruplet_loss_ref(anchor, positive, negative1, negative2)
    assert jnp.allclose(out, ref, rtol=1e-5, atol=1e-5), (out, ref)

    # Case 2: auto tile selection (>=2 grid steps) on the full batch.
    out_auto = quadruplet_loss(anchor, positive, negative1, negative2)
    jax.block_until_ready(out_auto)
    assert jnp.allclose(out_auto, ref, rtol=1e-5, atol=1e-5), (out_auto, ref)

    # Case 3: ragged batch (B % TB != 0) -> partial last block + true-B mean.
    B2 = 12
    out2 = quadruplet_loss(anchor[:B2], positive[:B2],
                           negative1[:B2], negative2[:B2])
    jax.block_until_ready(out2)
    ref2 = quadruplet_loss_ref(anchor[:B2], positive[:B2],
                               negative1[:B2], negative2[:B2])
    assert jnp.allclose(out2, ref2, rtol=1e-5, atol=1e-5), (out2, ref2)

    # Case 4: bf16 inputs exercise the deferred-upcast path.
    out_bf = quadruplet_loss(anchor.astype(jnp.bfloat16),
                             positive.astype(jnp.bfloat16),
                             negative1.astype(jnp.bfloat16),
                             negative2.astype(jnp.bfloat16))
    jax.block_until_ready(out_bf)
    assert jnp.allclose(out_bf, ref, rtol=2e-2, atol=2e-2), (out_bf, ref)

    print("KERNEL_OK")
</pallas_src>

<mosaic_0001>
module attributes {stable_mosaic.version = 11 : i64} {
  func.func @_quadruplet_loss_kernel(%arg0: i32, %arg1: memref<8x256xf32, #tpu.memory_space<vmem>>, %arg2: memref<8x256xf32, #tpu.memory_space<vmem>>, %arg3: memref<8x256xf32, #tpu.memory_space<vmem>>, %arg4: memref<8x256xf32, #tpu.memory_space<vmem>>, %arg5: memref<8x1xf32, #tpu.memory_space<vmem>>) attributes {dimension_semantics = [#tpu.dimension_semantics<parallel>], iteration_bounds = array<i64: 3>, scalar_prefetch = 0 : i64, scratch_operands = 0 : i64, tpu.core_type = #tpu.core_type<tc>, window_params = [{transform_indices = @transform_0, window_bounds = array<i64: 8, 256>}, {transform_indices = @transform_1, window_bounds = array<i64: 8, 256>}, {transform_indices = @transform_2, window_bounds = array<i64: 8, 256>}, {transform_indices = @transform_3, window_bounds = array<i64: 8, 256>}, {transform_indices = @transform_4, window_bounds = array<i64: 8, 1>}]} {
    %c0 = arith.constant 0 : index
    %c0_0 = arith.constant 0 : index
    %0 = vector.load %arg1[%c0, %c0_0] : memref<8x256xf32, #tpu.memory_space<vmem>>, vector<8x256xf32>
    %c0_1 = arith.constant 0 : index
    %c0_2 = arith.constant 0 : index
    %1 = vector.load %arg2[%c0_1, %c0_2] : memref<8x256xf32, #tpu.memory_space<vmem>>, vector<8x256xf32>
    %c0_3 = arith.constant 0 : index
    %c0_4 = arith.constant 0 : index
    %2 = vector.load %arg3[%c0_3, %c0_4] : memref<8x256xf32, #tpu.memory_space<vmem>>, vector<8x256xf32>
    %c0_5 = arith.constant 0 : index
    %c0_6 = arith.constant 0 : index
    %3 = vector.load %arg4[%c0_5, %c0_6] : memref<8x256xf32, #tpu.memory_space<vmem>>, vector<8x256xf32>
    %4 = arith.subf %0, %1 : vector<8x256xf32>
    %cst = arith.constant 9.99999997E-7 : f32
    %5 = vector.broadcast %cst : f32 to vector<8x256xf32>
    %6 = arith.addf %4, %5 : vector<8x256xf32>
    %7 = arith.mulf %6, %6 : vector<8x256xf32>
    %cst_7 = arith.constant dense<0.000000e+00> : vector<8xf32>
    %8 = vector.multi_reduction <add>, %7, %cst_7 [1] : vector<8x256xf32> to vector<8xf32>
    %9 = vector.shape_cast %8 : vector<8xf32> to vector<8x1xf32>
    %10 = math.sqrt %9 : vector<8x1xf32>
    %11 = arith.subf %0, %2 : vector<8x256xf32>
    %cst_8 = arith.constant 9.99999997E-7 : f32
    %12 = vector.broadcast %cst_8 : f32 to vector<8x256xf32>
    %13 = arith.addf %11, %12 : vector<8x256xf32>
    %14 = arith.mulf %13, %13 : vector<8x256xf32>
    %cst_9 = arith.constant dense<0.000000e+00> : vector<8xf32>
    %15 = vector.multi_reduction <add>, %14, %cst_9 [1] : vector<8x256xf32> to vector<8xf32>
    %16 = vector.shape_cast %15 : vector<8xf32> to vector<8x1xf32>
    %17 = math.sqrt %16 : vector<8x1xf32>
    %18 = arith.subf %2, %3 : vector<8x256xf32>
    %cst_10 = arith.constant 9.99999997E-7 : f32
    %19 = vector.broadcast %cst_10 : f32 to vector<8x256xf32>
    %20 = arith.addf %18, %19 : vector<8x256xf32>
    %21 = arith.mulf %20, %20 : vector<8x256xf32>
    %cst_11 = arith.constant dense<0.000000e+00> : vector<8xf32>
    %22 = vector.multi_reduction <add>, %21, %cst_11 [1] : vector<8x256xf32> to vector<8xf32>
    %23 = vector.shape_cast %22 : vector<8xf32> to vector<8x1xf32>
    %24 = math.sqrt %23 : vector<8x1xf32>
    %25 = arith.subf %10, %17 : vector<8x1xf32>
    %cst_12 = arith.constant 1.000000e+00 : f32
    %26 = vector.broadcast %cst_12 : f32 to vector<8x1xf32>
    %27 = arith.addf %25, %26 : vector<8x1xf32>
    %cst_13 = arith.constant 0.000000e+00 : f32
    %28 = vector.broadcast %cst_13 : f32 to vector<8x1xf32>
    %29 = arith.maximumf %27, %28 : vector<8x1xf32>
    %30 = arith.subf %10, %24 : vector<8x1xf32>
    %cst_14 = arith.constant 5.000000e-01 : f32
    %31 = vector.broadcast %cst_14 : f32 to vector<8x1xf32>
    %32 = arith.addf %30, %31 : vector<8x1xf32>
    %cst_15 = arith.constant 0.000000e+00 : f32
    %33 = vector.broadcast %cst_15 : f32 to vector<8x1xf32>
    %34 = arith.maximumf %32, %33 : vector<8x1xf32>
    %35 = arith.addf %29, %34 : vector<8x1xf32>
    %c0_16 = arith.constant 0 : index
    %c0_17 = arith.constant 0 : index
    %36 = vector.load %arg5[%c0_16, %c0_17] : memref<8x1xf32, #tpu.memory_space<vmem>>, vector<8x1xf32>
    tpu.vector_store %arg5[%c0_16, %c0_17], %35 {strides = array<i32>} : memref<8x1xf32, #tpu.memory_space<vmem>>, vector<8x1xf32>,
    return
  }
  func.func @transform_0(%arg0: i32) -> (i32, i32) {
    %c0_i32 = arith.constant 0 : i32
    %c0_i32_0 = arith.constant 0 : i32
    return %arg0, %c0_i32 : i32, i32
  }
  func.func @transform_1(%arg0: i32) -> (i32, i32) {
    %c0_i32 = arith.constant 0 : i32
    %c0_i32_0 = arith.constant 0 : i32
    return %arg0, %c0_i32 : i32, i32
  }
  func.func @transform_2(%arg0: i32) -> (i32, i32) {
    %c0_i32 = arith.constant 0 : i32
    %c0_i32_0 = arith.constant 0 : i32
    return %arg0, %c0_i32 : i32, i32
  }
  func.func @transform_3(%arg0: i32) -> (i32, i32) {
    %c0_i32 = arith.constant 0 : i32
    %c0_i32_0 = arith.constant 0 : i32
    return %arg0, %c0_i32 : i32, i32
  }
  func.func @transform_4(%arg0: i32) -> (i32, i32) {
    %c0_i32 = arith.constant 0 : i32
    %c0_i32_0 = arith.constant 0 : i32
    return %arg0, %c0_i32 : i32, i32
  }
}

</mosaic_0001>

<bundles_post_ra>
// kernel: tpu_custom_call.1
= control target key start
LH: loop header
LB: loop body
LE: loop exit
PB: predicated region body
PF: predicated region fallthrough
CT: control target
= control target key end

     0   :  { %9 = vsyncpa [#allocation3], 0  ;;  %s1019_s0 = inlined_call_operand.hbm [shape: f32[24,256], index: 0, kind: input, shape index: {}]   ;;  %s1020_s1 = inlined_call_operand.hbm [shape: f32[24,256], index: 1, kind: input, shape index: {}]   ;;  %s1021_s2 = inlined_call_operand.hbm [shape: f32[24,256], index: 2, kind: input, shape index: {}]   ;;  %s1022_s3 = inlined_call_operand.hbm [shape: f32[24,256], index: 3, kind: input, shape index: {}]   ;;  %s1023_s4 = inlined_call_operand.vmem [shape: f32[24,1], index: 4, kind: output, shape index: {}]  }
   0x1   :  { %11 = vsyncpa [#allocation3 + $0x1], 0 }
   0x2   :  { %12 = vsyncpa [#allocation5], 0 }
   0x3   :  { %14 = vsyncpa [#allocation5 + $0x1], 0 }
   0x4   :  { %15 = vsyncpa [#allocation8], 0 }
   0x5   :  { %17 = vsyncpa [#allocation8 + $0x1], 0  ;;  %s801_s15 = smov 0   ;;  %s803_s16 = smov 0  }
   0x6   :  { %s805_s17 = smov 0   ;;  %s807_s18 = smov 0  }
   0x7 LB: > { %s820_s19 = sadd.s32 4294967295, %s770_s18   ;;  %s823_s20 = sadd.s32 1, %s770_s18   ;;  %s770_s18 = sphi %s807_s18, %s1040_s18   ;;  %s766_s17 = sphi %s805_s17, %s1039_s17   ;;  %s762_s16 = sphi %s803_s16, %s1038_s16   ;;  %s758_s15 = sphi %s801_s15, %s1037_s15  }
   0x8   : > { %s27_s21 = ssub.s32 %s770_s18, %s823_s20  ;;  %s30_s22 = sadd.s32 1, %s766_s17 }
   0x9   : > { %p28_p0 = scmp.eq.s32.totalorder %s27_s21, 0  ;;  %p37_p1 = scmp.ne.s32.totalorder %s766_s17, %s762_s16 }
   0xa   : > { %p38_p2 = scmp.eq.s32.totalorder %s770_s18, 0  ;;  %p43_p3 = scmp.ne.s32.totalorder %s762_s16, %s758_s15 }
   0xb   : > { %s833_s23 = scalar_select %p28_p0, %s766_s17, %s30_s22  }
   0xc   : > { %p39_p4 = por %p38_p2, %p37_p1  ;;  %p44_p5 = scmp.eq.s32.totalorder %s820_s19, 0 }
   0xd   : > { %p569_p6 = scmp.lt.s32.totalorder %s770_s18, 3  ;;  %s842_s25 = sand.u32 1, %s766_s17  }
   0xe   : > { %p837_p7 = por %p44_p5, %p43_p3  ;;  %s845_s26 = sshll.u32 %s842_s25, 4 }
   0xf   : > { %s848_s27 = sshll.u32 %s770_s18, 8  ;;  %p850_p8 = pnand %p569_p6, %p39_p4 }
  0x10   : > { %s1027_s24 = scalar_select %p837_p7, 1, 0 }
  0x11   : > { %s1028_s28 = scalar_select %p850_p8, 1, 0 }
  0x12   : > { %s190_s29 = sand.u32 1, %s770_s18   ;;  %s859_s6 = scalar_lea.hbm %s1020_s1, %s848_s27 }
  0x13   : > { %s194_s7 = scalar_lea.vmem [#allocation4], %s845_s26  ;;  %s866_s9 = scalar_lea.sflag [#allocation5], %s190_s29 }
  0x14   : > { %s202_s8 = sshll.u32 %s194_s7, 4  ;;  %s608_s10 = scalar_lea.hbm %s859_s6, 256  ;;  %s863_s8 = int_to_ptr.vmem [resolvable:$true] %s202_s8 }
  0x15   : > { %p609_p11 = scmp.ne.s32.totalorder %s859_s6, %s608_s10  ;;  %p872_p12 = pneg %p850_p8 }
  0x16   : > { %s613_s14 = scalar_lea.hbm %s1020_s1, 768  ;;  %p614_p1 = scmp.lt.u32.totalorder %s859_s6, %s1020_s1 }
  0x17   : > { %p611_p13 = pnand %p872_p12, %p609_p11  ;;  %p615_p2 = scmp.lt.u32.totalorder %s613_s14, %s608_s10 }
  0x18   : > { %p617_p4 = scmp.lt.u32.totalorder %s608_s10, %s859_s6 }
  0x19   : > { %p612_p0 = pneg %p611_p13  ;;  %p616_p3 = por %p615_p2, %p614_p1 }
  0x1b   : > { %p618_p5 = por %p617_p4, %p616_p3 }
  0x1d   : > { %p619_p6 = pnand %p618_p5, %p612_p0 }
  0x1f   : > { %622 = shalt.err (!%p619_p6)
}
  0x20   : > { %s623_s22 = scalar_lea.vmem %s863_s8, 256  ;;  %s772_s29 = smov [#allocation4]  }
  0x21   : > { %p624_p11 = scmp.ne.s32.totalorder %s863_s8, %s623_s22  ;;  %s628_s30 = sshll.u32 %s772_s29, 4  ;;  %s629_s30 = int_to_ptr.vmem [resolvable:$false] %s628_s30 }
  0x22   : > { %s630_s5 = scalar_lea.vmem %s629_s30, 512  ;;  %p631_p10 = scmp.lt.s32.totalorder %s863_s8, %s629_s30 }
  0x23   : > { %p626_p13 = pnand %p624_p11, %p872_p12  ;;  %p632_p7 = scmp.lt.s32.totalorder %s630_s5, %s623_s22 }
  0x25   : > { %p627_p9 = pneg %p626_p13  ;;  %p633_p1 = por %p632_p7, %p631_p10 }
  0x27   : > { %p634_p2 = pnand %p633_p1, %p627_p9 }
  0x29   : > { %637 = shalt.err (!%p634_p2)
}
  0x2a   : > { %562 = dma.hbm_to_vmem [thread:$0]  (!%p850_p8), %s859_s6, 256, %s863_s8, %s866_s9  }
  0x2b   : > { %p1030_p0 = scmp.lt.s32.totalorder %s770_s18, 4  ;;  %p1031_p3 = scmp.ge.s32.totalorder %s770_s18, 1 }
  0x2c   : > { %s908_s13 = scalar_lea.hbm %s1019_s0, %s848_s27  ;;  %s175_s14 = scalar_lea.vmem [#allocation2], %s845_s26 }
  0x2d   : > { %p900_p4 = pnand %p1031_p3, %p1030_p0  ;;  %s183_s15 = sshll.u32 %s175_s14, 4  ;;  %s911_s15 = int_to_ptr.vmem [resolvable:$true] %s183_s15 }
  0x2e   : > { %s917_s18 = scalar_lea.hbm %s1021_s2, %s848_s27  ;;  %s172_s21 = scalar_lea.sflag [#allocation3], %s842_s25 }
  0x2f   : > { %s1032_s7 = scalar_select %p900_p4, 1, 0 }
  0x30   : > { %s638_s22 = scalar_lea.hbm %s908_s13, 256  ;;  %s643_s5 = scalar_lea.hbm %s1019_s0, 768 }
  0x31   : > { %p639_p7 = scmp.ne.s32.totalorder %s908_s13, %s638_s22  ;;  %p644_p5 = scmp.lt.u32.totalorder %s908_s13, %s1019_s0 }
  0x32   : > { %p645_p6 = scmp.lt.u32.totalorder %s643_s5, %s638_s22  ;;  %p647_p13 = scmp.lt.u32.totalorder %s638_s22, %s908_s13 }
  0x33   : > { %p641_p9 = pnand %p639_p7, %p872_p12 }
  0x34   : > { %p646_p11 = por %p645_p6, %p644_p5 }
  0x35   : > { %p642_p10 = pneg %p641_p9 }
  0x36   : > { %p648_p1 = por %p647_p13, %p646_p11 }
  0x38   : > { %p649_p2 = pnand %p648_p1, %p642_p10 }
  0x3a   : > { %652 = shalt.err (!%p649_p2)
}
  0x3b   : > { %s653_s14 = scalar_lea.vmem %s911_s15, 256  ;;  %s773_s6 = smov [#allocation2]  }
  0x3c   : > { %p654_p0 = scmp.ne.s32.totalorder %s911_s15, %s653_s14  ;;  %s658_s8 = sshll.u32 %s773_s6, 4  ;;  %s659_s8 = int_to_ptr.vmem [resolvable:$false] %s658_s8 }
  0x3d   : > { %s660_s29 = scalar_lea.vmem %s659_s8, 512  ;;  %p661_p9 = scmp.lt.s32.totalorder %s911_s15, %s659_s8 }
  0x3e   : > { %p656_p3 = pnand %p654_p0, %p872_p12  ;;  %p662_p4 = scmp.lt.s32.totalorder %s660_s29, %s653_s14 }
  0x40   : > { %p657_p7 = pneg %p656_p3  ;;  %p663_p5 = por %p662_p4, %p661_p9 }
  0x42   : > { %p664_p6 = pnand %p663_p5, %p657_p7 }
  0x44   : > { %667 = shalt.err (!%p664_p6)
}
  0x45   : > { %559 = dma.hbm_to_vmem [thread:$0]  (!%p850_p8), %s908_s13, 256, %s911_s15, %s172_s21  }
  0x46   : > { %s213_s22 = scalar_lea.vmem [#allocation6], %s845_s26  ;;  %s668_s5 = scalar_lea.hbm %s917_s18, 256 }
  0x47   : > { %s221_s30 = sshll.u32 %s213_s22, 4  ;;  %p669_p10 = scmp.ne.s32.totalorder %s917_s18, %s668_s5  ;;  %s222_s30 = int_to_ptr.vmem [resolvable:$true] %s221_s30 }
  0x48   : > { %s673_s14 = scalar_lea.hbm %s1021_s2, 768  ;;  %p674_p13 = scmp.lt.u32.totalorder %s917_s18, %s1021_s2 }
  0x49   : > { %p671_p4 = pnand %p669_p10, %p872_p12  ;;  %p675_p1 = scmp.lt.u32.totalorder %s673_s14, %s668_s5 }
  0x4a   : > { %p677_p0 = scmp.lt.u32.totalorder %s668_s5, %s917_s18 }
  0x4b   : > { %p672_p11 = pneg %p671_p4  ;;  %p676_p2 = por %p675_p1, %p674_p13 }
  0x4d   : > { %p678_p3 = por %p677_p0, %p676_p2 }
  0x4f   : > { %p679_p7 = pnand %p678_p3, %p672_p11 }
  0x51   : > { %682 = shalt.err (!%p679_p7)
}
  0x52   : > { %s683_s13 = scalar_lea.vmem %s222_s30, 256  ;;  %s774_s15 = smov [#allocation6]  }
  0x53   : > { %p684_p9 = scmp.ne.s32.totalorder %s222_s30, %s683_s13  ;;  %s688_s21 = sshll.u32 %s774_s15, 4  ;;  %s689_s21 = int_to_ptr.vmem [resolvable:$false] %s688_s21 }
  0x54   : > { %s690_s29 = scalar_lea.vmem %s689_s21, 512  ;;  %p691_p10 = scmp.lt.s32.totalorder %s222_s30, %s689_s21 }
  0x55   : > { %p686_p5 = pnand %p684_p9, %p872_p12  ;;  %p692_p4 = scmp.lt.s32.totalorder %s690_s29, %s683_s13 }
  0x57   : > { %p687_p6 = pneg %p686_p5  ;;  %p693_p8 = por %p692_p4, %p691_p10 }
  0x59   : > { %p694_p1 = pnand %p693_p8, %p687_p6 }
  0x5b   : > { %697 = shalt.err (!%p694_p1)
}
  0x5c   : > { %p1033_p13 = scmp.ne.s32.totalorder %s1028_s28, 0  ;;  %s964_s10 = scalar_lea.hbm %s1022_s3, %s848_s27 }
  0x5d   : > { %s232_s12 = scalar_lea.vmem [#allocation7], %s845_s26  ;;  %s229_s6 = scalar_lea.sflag [#allocation8], %s842_s25 }
  0x5e   : > { %565 = dma.hbm_to_vmem [thread:$0]  (!%p1033_p13), %s917_s18, 256, %s222_s30, %s866_s9  }
  0x5f   : > { %s240_s14 = sshll.u32 %s232_s12, 4  ;;  %s698_s8 = scalar_lea.hbm %s964_s10, 256  ;;  %s241_s14 = int_to_ptr.vmem [resolvable:$true] %s240_s14 }
  0x60   : > { %p699_p8 = scmp.ne.s32.totalorder %s964_s10, %s698_s8  ;;  %s703_s18 = scalar_lea.hbm %s1022_s3, 768 }
  0x61   : > { %p704_p0 = scmp.lt.u32.totalorder %s964_s10, %s1022_s3  ;;  %p705_p3 = scmp.lt.u32.totalorder %s703_s18, %s698_s8 }
  0x62   : > { %p701_p11 = pnand %p699_p8, %p872_p12  ;;  %p707_p9 = scmp.lt.u32.totalorder %s698_s8, %s964_s10 }
  0x63   : > { %p706_p7 = por %p705_p3, %p704_p0 }
  0x64   : > { %p702_p2 = pneg %p701_p11 }
  0x65   : > { %p708_p5 = por %p707_p9, %p706_p7 }
  0x67   : > { %p709_p6 = pnand %p708_p5, %p702_p2 }
  0x69   : > { %712 = shalt.err (!%p709_p6)
}
  0x6a   : > { %s713_s25 = scalar_lea.vmem %s241_s14, 256  ;;  %s775_s26 = smov [#allocation7]  }
  0x6b   : > { %p714_p10 = scmp.ne.s32.totalorder %s241_s14, %s713_s25  ;;  %s718_s15 = sshll.u32 %s775_s26, 4  ;;  %s719_s15 = int_to_ptr.vmem [resolvable:$false] %s718_s15 }
  0x6c   : > { %s720_s21 = scalar_lea.vmem %s719_s15, 512  ;;  %p721_p8 = scmp.lt.s32.totalorder %s241_s14, %s719_s15 }
  0x6d   : > { %p716_p4 = pnand %p714_p10, %p872_p12  ;;  %p722_p11 = scmp.lt.s32.totalorder %s720_s21, %s713_s25 }
  0x6f   : > { %p717_p1 = pneg %p716_p4  ;;  %p723_p13 = por %p722_p11, %p721_p8 }
  0x71   : > { %p724_p0 = pnand %p723_p13, %p717_p1 }
  0x73   : > { %727 = shalt.err (!%p724_p0)
}
  0x74   : > { %p1034_p3 = scmp.ne.s32.totalorder %s1028_s28, 0  ;;  %p1035_p2 = scmp.ne.s32.totalorder %s1032_s7, 0 }
  0x75   : > { %s251_s11 = sand.u32 (!%p1035_p2), 1, %s762_s16   ;;  %p1036_p12 = scmp.ne.s32.totalorder (!%p1035_p2), %s1027_s24, 0 }
  0x76   : > { %568 = dma.hbm_to_vmem [thread:$0]  (!%p1034_p3), %s964_s10, 256, %s241_s14, %s229_s6  }
  0x77   : > { %249 = sbr.rel (%p1035_p2) target bundleno = 315 (0x13b), region = 36  ;;  %s537_s29 = sshll.u32 (!%p1035_p2), %s251_s11, 4 }
  0x78   : > { %s252_s22 = scalar_lea.sflag (!%p1035_p2), [#allocation3], %s251_s11  ;;  %s255_s5 = scalar_lea.vmem (!%p1035_p2), [#allocation2], %s537_s29 }
  0x7e   : > { %745 = dma.done.wait (%p1036_p12), %s252_s22, 256  }
  0x7f   : > { %747 = vsyncadd (%p1036_p12), %s252_s22, 4294967040  ;;  %s260_s12 = sand.u32 1, %s820_s19   ;;  %s264_s8 = scalar_lea.vmem [#allocation4], %s537_s29 }
  0x80   : > { %s261_s28 = scalar_lea.sflag [#allocation5], %s260_s12 }
  0x81   : > { %749 = dma.done.wait (%p1036_p12), %s261_s28, 512  }
  0x82   : > { %751 = vsyncadd (%p1036_p12), %s261_s28, 4294966784  ;;  %s273_s7 = scalar_lea.vmem [#allocation6], %s537_s29  ;;  %s279_s10 = scalar_lea.sflag [#allocation8], %s251_s11 }
  0x83   : > { %s282_s14 = scalar_lea.vmem [#allocation7], %s537_s29 }
  0x84   : > { %753 = dma.done.wait (%p1036_p12), %s279_s10, 256  }
  0x85   : > { %755 = vsyncadd (%p1036_p12), %s279_s10, 4294967040  ;;  %v329_v0 = vld [vmem:[%s273_s7] sm:$0xff]  ;;  %v330_v1 = vld [vmem:[%s273_s7 + $0x8] sm:$0xff]  ;;  %p321_p13 = scmp.lt.s32.totalorder %s820_s19, 2  ;;  %vm388_vm6 = vcmask 7168  }
  0x86   : > { %v331_v2 = vld [vmem:[%s282_s14] sm:$0xff]  ;;  %v332_v3 = vld [vmem:[%s282_s14 + $0x8] sm:$0xff] }
  0x87   : > { %v365_v4 = vsub.f32 %v329_v0, %v331_v2  ;;  %v325_v5 = vld [vmem:[%s255_s5] sm:$0xff]  ;;  %v326_v6 = vld [vmem:[%s255_s5 + $0x8] sm:$0xff]  ;;  %v366_v7 = vsub.f32 %v330_v1, %v332_v3  ;;  %s1042_s19 = smov (!%p321_p13, %s820_s19), 2 }
  0x88   : > { %v327_v8 = vld [vmem:[%s264_s8] sm:$0xff]  ;;  %v328_v9 = vld [vmem:[%s264_s8 + $0x8] sm:$0xff]  ;;  %v349_v10 = vsub.f32 %v325_v5, %v329_v0  ;;  %v350_v11 = vsub.f32 %v326_v6, %v330_v1  ;;  %s541_s24 = sshll.u32 %s1042_s19, 3 }
  0x89   : > { %v367_v12 = vadd.f32 1e-06, %v365_v4  ;;  %v333_v13 = vsub.f32 %v325_v5, %v327_v8  ;;  %v334_v14 = vsub.f32 %v326_v6, %v328_v9  ;;  %v368_v15 = vadd.f32 1e-06, %v366_v7  ;;  %s324_s9 = scalar_lea.vmem %s1023_s4, %s541_s24 }
  0x8a   : > { %v351_v16 = vadd.f32 1e-06, %v349_v10  ;;  %v352_v17 = vadd.f32 1e-06, %v350_v11 }
  0x8b   : > { %v369_v18 = vmul.f32 %v367_v12, %v367_v12  ;;  %v335_v19 = vadd.f32 1e-06, %v333_v13  ;;  %v336_v20 = vadd.f32 1e-06, %v334_v14  ;;  %v370_v21 = vmul.f32 %v368_v15, %v368_v15 }
  0x8c   : > { %v353_v24 = vmul.f32 %v351_v16, %v351_v16  ;;  %v354_v25 = vmul.f32 %v352_v17, %v352_v17 }
  0x8d   : > { %v337_v22 = vmul.f32 %v335_v19, %v335_v19  ;;  %v338_v23 = vmul.f32 %v336_v20, %v336_v20  ;;  %v371_v26 = vadd.f32 %v370_v21, %v369_v18 }
  0x8e   : > { %v355_v28 = vadd.f32 %v354_v25, %v353_v24 }
  0x8f   : > { %v339_v27 = vadd.f32 %v338_v23, %v337_v22  ;;  %372 = vadd.xlane.f32.xlu1 %v371_v26 }
  0x91   : > { %340 = vadd.xlane.f32.xlu0 %v339_v27 }
  0x95   : > { %356 = vadd.xlane.f32.xlu0 %v355_v28 }
 0x11c   : > { %v373_v29 = vpop.xlane.xlu1 %372 }
 0x11d   : > { %602 = vrsqrt.f32 %v373_v29  ;;  %vm376_vm0 = vcmp.eq.f32.partialorder %v373_v29, inf  ;;  %v379_v35 = vand.u32 2147483648, %v373_v29  ;;  %vm378_vm1 = vcmp.eq.f32.partialorder %v373_v29, 0.0 }
 0x11e   : > { %v341_v30 = vpop.xlane.xlu0 %340 }
 0x11f   : > { %604 = vrsqrt.f32 %v341_v30  ;;  %vm344_vm2 = vcmp.eq.f32.partialorder %v341_v30, inf  ;;  %v347_v38 = vand.u32 2147483648, %v341_v30  ;;  %vm346_vm3 = vcmp.eq.f32.partialorder %v341_v30, 0.0 }
 0x122   : > { %v357_v31 = vpop.xlane.xlu0 %356 }
 0x123   : > { %606 = vrsqrt.f32 %v357_v31  ;;  %vm360_vm4 = vcmp.eq.f32.partialorder %v357_v31, inf  ;;  %v363_v45 = vand.u32 2147483648, %v357_v31  ;;  %vm362_vm5 = vcmp.eq.f32.partialorder %v357_v31, 0.0 }
 0x127   : > { %v603_v32 = vpop.eup %602 }
 0x128   : > { %v375_v34 = vmul.f32 %v603_v32, %v373_v29 }
 0x129   : > { %v605_v33 = vpop.eup %604 }
 0x12a   : > { %v343_v36 = vmul.f32 %v605_v33, %v341_v30  ;;  %v377_v37 = vsel %vm376_vm0, %v373_v29, %v375_v34 }
 0x12b   : > { %v380_v39 = vsel %vm378_vm1, %v379_v35, %v377_v37 }
 0x12c   : > { %v345_v40 = vsel %vm344_vm2, %v341_v30, %v343_v36 }
 0x12d   : > { %v607_v41 = vpop.eup %606  ;;  %v348_v42 = vsel %vm346_vm3, %v347_v38, %v345_v40 }
 0x12e   : > { %v384_v43 = vsub.f32 %v348_v42, %v380_v39  ;;  %v359_v44 = vmul.f32 %v607_v41, %v357_v31 }
 0x130   : > { %v361_v46 = vsel %vm360_vm4, %v357_v31, %v359_v44  ;;  %v385_v48 = vadd.f32 0.5, %v384_v43 }
 0x131   : > { %v364_v47 = vsel %vm362_vm5, %v363_v45, %v361_v46 }
 0x132   : > { %v381_v49 = vsub.f32 %v348_v42, %v364_v47  ;;  %v386_v51 = vmax.f32 %v385_v48, 0.0 }
 0x134   : > { %v382_v50 = vadd.f32 1.0, %v381_v49 }
 0x136   : > { %v383_v52 = vmax.f32 %v382_v50, 0.0 }
 0x138   : > { %v387_v53 = vadd.f32 %v386_v51, %v383_v52 }
 0x13a   : > { %389 = vst.msk [vmem:[%s324_s9] sm:$0xff] %vm388_vm6, %v387_v53 }
 0x13b PF: > { %p20_p7 = scmp.ge.s32.totalorder %s823_s20, 5   ;;  %s1037_s15 = smov %s762_s16 }
 0x13c   : > { %s1038_s16 = smov %s766_s17  ;;  %s1039_s17 = smov %s833_s23 }
 0x13d   : > { %s1040_s18 = smov %s823_s20  ;;  %22 = sbr.rel (!%p20_p7) target bundleno = 7 (0x7), region = 113 }
 0x144   :  { %409 = vsyncpa [#allocation3], 1 }
 0x145   :  { %411 = vsyncpa [#allocation3 + $0x1], 1 }
 0x146   :  { %412 = vsyncpa [#allocation5], 1 }
 0x147   :  { %414 = vsyncpa [#allocation5 + $0x1], 1 }
 0x148   :  { %415 = vsyncpa [#allocation8], 1 }
 0x149   :  { %417 = vsyncpa [#allocation8 + $0x1], 1 }

</bundles_post_ra>
